<compile_context>
chip_gen: v6e
topology: v6e:2x2x1
jax: 0.10.0
libtpu: 0.0.40
codegen_flags: <defaults>
</compile_context>

<pallas_src>
import math
from functools import partial

import jax
import jax.numpy as jnp
from jax.experimental import pallas as pl
from jax.experimental.pallas import tpu as pltpu

# ----------------------------- small config ---------------------------------
BATCH = 2            # batch_size / number_gpu
FRAMES = 8           # frames_sequence
FRAME_SIZE = 16      # H = W
IN_CH = 3
FEATURE_SIZE = 32    # resnet feature size (1000 in the real model, small here)
FEATURE_DS = 16      # feature_size_ds
N_CLASSES = 4
C_PAD = 128          # lane-dense padded class dim for the output block
# attention_arch != 'dec'  ->  fc3 input dim = frames_sequence


# ---------------- fused per-batch Pallas kernel (grid=(B,)) ------------------
def _bnet_fused_kernel(xf_ref, wf_ref, bf_ref, w4r_ref, w3p_ref, bh_ref, o_ref,
                       *, inv_sqrt_d):
    # (1) feature-extractor stand-in + dim_ds folded into one bf16 matmul.
    x = xf_ref[0]                                                    # (T, K) bf16
    feat = (jnp.dot(x, wf_ref[...], preferred_element_type=jnp.float32)
            + bf_ref[...])                                           # (T, D) f32

    # fc4 applied to the attention *values* is reassociated to the inputs:
    #   a @ w4 = (p @ feat) @ w4 = p @ (feat @ w4)   (exact)
    fv = jnp.sum(feat * w4r_ref[...], axis=-1, keepdims=True)        # (T, 1)

    # (2) per-batch scaled-dot-product self-attention over the frame sequence.
    # TODO(synk): PayAttention2D source not provided; approximated with scaled
    # dot-product self-attention (same (B, T, feature_size_ds) contract).
    s = jax.lax.dot_general(feat, feat, (((1,), (1,)), ((), ())),
                            preferred_element_type=jnp.float32)      # (T, T)
    s = s * inv_sqrt_d
    s = s - jnp.max(s, axis=-1, keepdims=True)
    p = jnp.exp(s)
    l = jnp.sum(p, axis=-1, keepdims=True)                           # (T, 1)
    av = jnp.dot(p, fv, preferred_element_type=jnp.float32) / l      # (T, 1)

    # (3) transpose -> fc3 -> transpose -> fc4, reassociated (no transposes):
    #     out[c] = sum_t w3[t, c] * av[t] + (b3[c] * sum(w4) + b4)
    out = jnp.sum(av * w3p_ref[...], axis=0, keepdims=True) + bh_ref[...]  # (1, C_PAD)
    o_ref[0] = out.astype(o_ref.dtype)


def bnet_fused_pallas(xf, w_fused, b_fused, w4row, w3_pad, b_head_pad):
    B, T, K = xf.shape
    D = w_fused.shape[1]
    kernel = partial(_bnet_fused_kernel, inv_sqrt_d=1.0 / math.sqrt(D))
    return pl.pallas_call(
        kernel,
        out_shape=jax.ShapeDtypeStruct((B, 1, C_PAD), jnp.float32),
        grid=(B,),
        in_specs=[
            pl.BlockSpec((1, T, K), lambda b: (b, 0, 0)),     # xf        (B, T, K) bf16
            pl.BlockSpec((K, D), lambda b: (0, 0)),           # w_fused   (K, D)    bf16
            pl.BlockSpec((1, D), lambda b: (0, 0)),           # b_fused   (1, D)    f32
            pl.BlockSpec((1, D), lambda b: (0, 0)),           # w4row     (1, D)    f32
            pl.BlockSpec((T, C_PAD), lambda b: (0, 0)),       # w3_pad    (T, 128)  f32
            pl.BlockSpec((1, C_PAD), lambda b: (0, 0)),       # b_head    (1, 128)  f32
        ],
        out_specs=pl.BlockSpec((1, 1, C_PAD), lambda b: (b, 0, 0)),
        compiler_params=pltpu.CompilerParams(
            dimension_semantics=("parallel",)),                # shards B over v7x TCs
    )(xf, w_fused, b_fused, w4row, w3_pad, b_head_pad)


# ------------------------------ parameters ----------------------------------
def xavier_uniform(key, shape):
    fan_in, fan_out = shape
    bound = math.sqrt(6.0 / (fan_in + fan_out))
    return jax.random.uniform(key, shape, jnp.float32, -bound, bound)


def init_params(key):
    k_feat, k_ds, k3, k4 = jax.random.split(key, 4)
    return {
        # TODO(synk): resnet50 feature extractor replaced by a frozen
        # flatten->linear stand-in (same (B*T, feature_size) output contract).
        "w_feat": xavier_uniform(k_feat, (IN_CH * FRAME_SIZE * FRAME_SIZE, FEATURE_SIZE)),
        "b_feat": jnp.zeros((FEATURE_SIZE,), jnp.float32),
        "w_ds": xavier_uniform(k_ds, (FEATURE_SIZE, FEATURE_DS)),
        "b_ds": jnp.zeros((FEATURE_DS,), jnp.float32),
        "w3": xavier_uniform(k3, (FRAMES, N_CLASSES)),
        "b3": jnp.zeros((N_CLASSES,), jnp.float32),
        "w4": xavier_uniform(k4, (FEATURE_DS, 1)),
        "b4": jnp.zeros((1,), jnp.float32),
    }


def fold_params(params):
    """One-time (hoisted) folding of the frozen weights — NOT inside the jitted
    forward, so none of this runs per call."""
    # backbone stand-in + dim_ds folded (exact: no nonlinearity between them)
    w_fused = (params["w_feat"] @ params["w_ds"]).astype(jnp.bfloat16)          # (K, D)
    b_fused = (params["b_feat"] @ params["w_ds"] + params["b_ds"]
               ).reshape(1, FEATURE_DS).astype(jnp.float32)                     # (1, D)
    # fc4 folded through fc3's bias path:  b_head = b3 * sum(w4) + b4
    w4row = params["w4"].reshape(1, FEATURE_DS).astype(jnp.float32)             # (1, D)
    b_head = (params["b3"] * jnp.sum(params["w4"]) + params["b4"]
              ).reshape(1, N_CLASSES)                                           # (1, C)
    # pad class dim to 128 so the kernel's output store is lane-dense
    w3_pad = jnp.pad(params["w3"], ((0, 0), (0, C_PAD - N_CLASSES)))            # (T, 128)
    b_head_pad = jnp.pad(b_head, ((0, 0), (0, C_PAD - N_CLASSES)))              # (1, 128)
    return {"w_fused": w_fused, "b_fused": b_fused, "w4row": w4row,
            "w3_pad": w3_pad, "b_head_pad": b_head_pad}


# ------------------------------- forward ------------------------------------
@jax.jit
def bnet_forward(x, folded):
    B, T, C, H, W = x.shape
    # x.view(batch*frames, 3, H, W), kept batch-major for the per-batch grid;
    # flatten pixels for the stand-in backbone and cast to bf16 for the MXU.
    xf = x.reshape(B, T, C * H * W).astype(jnp.bfloat16)
    out = bnet_fused_pallas(xf, folded["w_fused"], folded["b_fused"],
                            folded["w4row"], folded["w3_pad"],
                            folded["b_head_pad"])                    # (B, 1, C_PAD)
    return out[:, 0, :N_CLASSES].reshape(B, N_CLASSES, 1)            # (B, n_classes, 1)


# --------------------------------- main --------------------------------------
if __name__ == "__main__":
    key = jax.random.PRNGKey(0)
    k_param, k_x = jax.random.split(key)
    params = init_params(k_param)
    folded = fold_params(params)          # hoisted: runs once, not per forward
    x = jax.random.normal(
        k_x, (BATCH, FRAMES, IN_CH, FRAME_SIZE, FRAME_SIZE), jnp.float32
    )
    out = bnet_forward(x, folded)
    out = jax.block_until_ready(out)
    assert out.shape == (BATCH, N_CLASSES, 1), out.shape
    print("KERNEL_OK")
</pallas_src>

<mosaic_0001>
module attributes {stable_mosaic.version = 11 : i64} {
  func.func @_bnet_fused_kernel(%arg0: i32, %arg1: memref<1x8x768xbf16, #tpu.memory_space<vmem>>, %arg2: memref<768x16xbf16, #tpu.memory_space<vmem>>, %arg3: memref<1x16xf32, #tpu.memory_space<vmem>>, %arg4: memref<1x16xf32, #tpu.memory_space<vmem>>, %arg5: memref<8x128xf32, #tpu.memory_space<vmem>>, %arg6: memref<1x128xf32, #tpu.memory_space<vmem>>, %arg7: memref<1x1x128xf32, #tpu.memory_space<vmem>>) attributes {dimension_semantics = [#tpu.dimension_semantics<parallel>], iteration_bounds = array<i64: 2>, scalar_prefetch = 0 : i64, scratch_operands = 0 : i64, tpu.core_type = #tpu.core_type<tc>, window_params = [{transform_indices = @transform_0, window_bounds = array<i64: 1, 8, 768>}, {pipeline_mode = #tpu.pipeline_mode<synchronous>, transform_indices = @transform_1, window_bounds = array<i64: 768, 16>}, {pipeline_mode = #tpu.pipeline_mode<synchronous>, transform_indices = @transform_2, window_bounds = array<i64: 1, 16>}, {pipeline_mode = #tpu.pipeline_mode<synchronous>, transform_indices = @transform_3, window_bounds = array<i64: 1, 16>}, {pipeline_mode = #tpu.pipeline_mode<synchronous>, transform_indices = @transform_4, window_bounds = array<i64: 8, 128>}, {pipeline_mode = #tpu.pipeline_mode<synchronous>, transform_indices = @transform_5, window_bounds = array<i64: 1, 128>}, {transform_indices = @transform_6, window_bounds = array<i64: 1, 1, 128>}]} {
    %c0 = arith.constant 0 : index
    %c0_0 = arith.constant 0 : index
    %c0_1 = arith.constant 0 : index
    %0 = vector.load %arg1[%c0, %c0_0, %c0_1] : memref<1x8x768xbf16, #tpu.memory_space<vmem>>, vector<1x8x768xbf16>
    %1 = vector.shape_cast %0 : vector<1x8x768xbf16> to vector<8x768xbf16>
    %c0_2 = arith.constant 0 : index
    %c0_3 = arith.constant 0 : index
    %2 = vector.load %arg2[%c0_2, %c0_3] : memref<768x16xbf16, #tpu.memory_space<vmem>>, vector<768x16xbf16>
    %cst = arith.constant dense<0.000000e+00> : vector<8x16xf32>
    %3 = tpu.matmul %1, %2, %cst {dimension_numbers = #tpu.dot_dimension_numbers<[1], [0], [0], [1], [0, 0, 1, 1], [], []>} : vector<8x768xbf16>, vector<768x16xbf16>, vector<8x16xf32> -> vector<8x16xf32>
    %c0_4 = arith.constant 0 : index
    %c0_5 = arith.constant 0 : index
    %4 = vector.load %arg3[%c0_4, %c0_5] : memref<1x16xf32, #tpu.memory_space<vmem>>, vector<1x16xf32>
    %5 = vector.broadcast %4 : vector<1x16xf32> to vector<8x16xf32>
    %6 = arith.addf %3, %5 : vector<8x16xf32>
    %c0_6 = arith.constant 0 : index
    %c0_7 = arith.constant 0 : index
    %7 = vector.load %arg4[%c0_6, %c0_7] : memref<1x16xf32, #tpu.memory_space<vmem>>, vector<1x16xf32>
    %8 = vector.broadcast %7 : vector<1x16xf32> to vector<8x16xf32>
    %9 = arith.mulf %6, %8 : vector<8x16xf32>
    %cst_8 = arith.constant dense<0.000000e+00> : vector<8xf32>
    %10 = vector.multi_reduction <add>, %9, %cst_8 [1] : vector<8x16xf32> to vector<8xf32>
    %11 = vector.shape_cast %10 : vector<8xf32> to vector<8x1xf32>
    %cst_9 = arith.constant dense<0.000000e+00> : vector<8x8xf32>
    %12 = tpu.matmul %6, %6, %cst_9 {dimension_numbers = #tpu.dot_dimension_numbers<[1], [1], [0], [0], [0, 0, 1, 0], [], []>} : vector<8x16xf32>, vector<8x16xf32>, vector<8x8xf32> -> vector<8x8xf32>
    %cst_10 = arith.constant 2.500000e-01 : f32
    %13 = vector.broadcast %cst_10 : f32 to vector<8x8xf32>
    %14 = arith.mulf %12, %13 : vector<8x8xf32>
    %cst_11 = arith.constant dense<0xFF800000> : vector<8xf32>
    %15 = vector.multi_reduction <maximumf>, %14, %cst_11 [1] : vector<8x8xf32> to vector<8xf32>
    %16 = vector.shape_cast %15 : vector<8xf32> to vector<8x1xf32>
    %17 = vector.broadcast %16 : vector<8x1xf32> to vector<8x8xf32>
    %18 = arith.subf %14, %17 : vector<8x8xf32>
    %19 = math.exp %18 : vector<8x8xf32>
    %cst_12 = arith.constant dense<0.000000e+00> : vector<8xf32>
    %20 = vector.multi_reduction <add>, %19, %cst_12 [1] : vector<8x8xf32> to vector<8xf32>
    %21 = vector.shape_cast %20 : vector<8xf32> to vector<8x1xf32>
    %cst_13 = arith.constant dense<0.000000e+00> : vector<8x1xf32>
    %22 = tpu.matmul %19, %11, %cst_13 {dimension_numbers = #tpu.dot_dimension_numbers<[1], [0], [0], [1], [0, 0, 1, 1], [], []>} : vector<8x8xf32>, vector<8x1xf32>, vector<8x1xf32> -> vector<8x1xf32>
    %23 = arith.divf %22, %21 : vector<8x1xf32>
    %c0_14 = arith.constant 0 : index
    %c0_15 = arith.constant 0 : index
    %24 = vector.load %arg5[%c0_14, %c0_15] : memref<8x128xf32, #tpu.memory_space<vmem>>, vector<8x128xf32>
    %25 = vector.broadcast %23 : vector<8x1xf32> to vector<8x128xf32>
    %26 = arith.mulf %25, %24 : vector<8x128xf32>
    %cst_16 = arith.constant dense<0.000000e+00> : vector<128xf32>
    %27 = vector.multi_reduction <add>, %26, %cst_16 [0] : vector<8x128xf32> to vector<128xf32>
    %28 = vector.shape_cast %27 : vector<128xf32> to vector<1x128xf32>
    %c0_17 = arith.constant 0 : index
    %c0_18 = arith.constant 0 : index
    %29 = vector.load %arg6[%c0_17, %c0_18] : memref<1x128xf32, #tpu.memory_space<vmem>>, vector<1x128xf32>
    %30 = arith.addf %28, %29 : vector<1x128xf32>
    %c0_19 = arith.constant 0 : index
    %c0_20 = arith.constant 0 : index
    %c0_21 = arith.constant 0 : index
    %31 = vector.load %arg7[%c0_19, %c0_20, %c0_21] : memref<1x1x128xf32, #tpu.memory_space<vmem>>, vector<1x1x128xf32>
    %32 = vector.shape_cast %31 : vector<1x1x128xf32> to vector<1x128xf32>
    %33 = vector.shape_cast %30 : vector<1x128xf32> to vector<1x1x128xf32>
    tpu.vector_store %arg7[%c0_19, %c0_20, %c0_21], %33 {strides = array<i32>} : memref<1x1x128xf32, #tpu.memory_space<vmem>>, vector<1x1x128xf32>,
    return
  }
  func.func @transform_0(%arg0: i32) -> (i32, i32, i32) {
    %c0_i32 = arith.constant 0 : i32
    %c0_i32_0 = arith.constant 0 : i32
    %c0_i32_1 = arith.constant 0 : i32
    return %arg0, %c0_i32, %c0_i32_0 : i32, i32, i32
  }
  func.func @transform_1(%arg0: i32) -> (i32, i32) {
    %c0_i32 = arith.constant 0 : i32
    %c0_i32_0 = arith.constant 0 : i32
    %c0_i32_1 = arith.constant 0 : i32
    return %c0_i32, %c0_i32_0 : i32, i32
  }
  func.func @transform_2(%arg0: i32) -> (i32, i32) {
    %c0_i32 = arith.constant 0 : i32
    %c0_i32_0 = arith.constant 0 : i32
    %c0_i32_1 = arith.constant 0 : i32
    return %c0_i32, %c0_i32_0 : i32, i32
  }
  func.func @transform_3(%arg0: i32) -> (i32, i32) {
    %c0_i32 = arith.constant 0 : i32
    %c0_i32_0 = arith.constant 0 : i32
    %c0_i32_1 = arith.constant 0 : i32
    return %c0_i32, %c0_i32_0 : i32, i32
  }
  func.func @transform_4(%arg0: i32) -> (i32, i32) {
    %c0_i32 = arith.constant 0 : i32
    %c0_i32_0 = arith.constant 0 : i32
    %c0_i32_1 = arith.constant 0 : i32
    return %c0_i32, %c0_i32_0 : i32, i32
  }
  func.func @transform_5(%arg0: i32) -> (i32, i32) {
    %c0_i32 = arith.constant 0 : i32
    %c0_i32_0 = arith.constant 0 : i32
    %c0_i32_1 = arith.constant 0 : i32
    return %c0_i32, %c0_i32_0 : i32, i32
  }
  func.func @transform_6(%arg0: i32) -> (i32, i32, i32) {
    %c0_i32 = arith.constant 0 : i32
    %c0_i32_0 = arith.constant 0 : i32
    %c0_i32_1 = arith.constant 0 : i32
    return %arg0, %c0_i32, %c0_i32_0 : i32, i32, i32
  }
}

</mosaic_0001>

<bundles_post_ra>
// kernel: bnet_forward.1
= control target key start
LH: loop header
LB: loop body
LE: loop exit
PB: predicated region body
PF: predicated region fallthrough
CT: control target
= control target key end

     0   :  { %s1283_s21 = smov 0   ;;  %s1471_s0 = inlined_call_operand.vmem [shape: bf16[2,8,768], index: 0, kind: input, shape index: {}]   ;;  %s1472_s1 = inlined_call_operand.vmem [shape: bf16[768,16], index: 1, kind: input, shape index: {}]   ;;  %s1473_s2 = inlined_call_operand.vmem [shape: f32[1,16], index: 2, kind: input, shape index: {}]   ;;  %s1474_s3 = inlined_call_operand.vmem [shape: f32[1,16], index: 3, kind: input, shape index: {}]   ;;  %s1475_s4 = inlined_call_operand.vmem [shape: f32[8,128], index: 4, kind: input, shape index: {}]   ;;  %s1476_s5 = inlined_call_operand.vmem [shape: f32[1,128], index: 5, kind: input, shape index: {}]   ;;  %s1477_s6 = inlined_call_operand.vmem [shape: f32[2,1,128], index: 6, kind: output, shape index: {}]  }
   0x1 LB: > { %s1018_s22 = sadd.s32 4294967295, %s1243_s21   ;;  %p1022_p0 = scmp.ge.s32.totalorder %s1243_s21, 1  ;;  %s1243_s21 = sphi %s1283_s21, %s16_s21  }
   0x2   : > { %p212_p1 = scmp.lt.s32.totalorder %s1243_s21, 3 }
   0x4   : > { %p213_p2 = pnand %p1022_p0, %p212_p1 }
   0x5   : > { %p240_p3 = scmp.lt.s32.totalorder (!%p213_p2), %s1018_s22, 1 }
   0x6   : > { %216 = sbr.rel (%p213_p2) target bundleno = 966 (0x3c6), region = 44 }
   0xb   : > { %v1179_v0 = vld [vmem:[%s1472_s1 + $0x78] sm:$0xff]   ;;  %v1183_v4 = vld [vmem:[%s1472_s1 + $0x70] sm:$0xff]   ;;  %v1187_v8 = vld [vmem:[%s1472_s1 + $0x68] sm:$0xff]   ;;  %s1479_s22 = smov (!%p240_p3, %s1018_s22), 1  ;;  %v1245_v57 = vmov 0.0   ;;  %vm1246_vm0 = vmmov 0  }
   0xc   : > { %v1180_v1 = vld [vmem:[%s1472_s1 + $0x38] sm:$0xff]   ;;  %1085 = vmatprep.subr.bf16.mxu0 %v1179_v0  ;;  %v1184_v5 = vld [vmem:[%s1472_s1 + $0x30] sm:$0xff]   ;;  %v1188_v9 = vld [vmem:[%s1472_s1 + $0x28] sm:$0xff]   ;;  %s1165_s29 = smul.u32 24, %s1479_s22  ;;  %vm792_vm1 = vcmask 130048   ;;  %vm870_vm2 = vcmask 64512   ;;  %s247_s24 = scalar_lea.vmem %s1477_s6, %s1479_s22 }
   0xd   : > { %v1181_v2 = vld [vmem:[%s1472_s1 + $0xf8] sm:$0xff]   ;;  %1086 = vmatpush3.bf16.msra.mxu0 %v1180_v1  ;;  %v1185_v6 = vld [vmem:[%s1472_s1 + $0xf0] sm:$0xff]   ;;  %v1189_v10 = vld [vmem:[%s1472_s1 + $0xe8] sm:$0xff]  }
   0xe   : > { %v1182_v3 = vld [vmem:[%s1472_s1 + $0xb8] sm:$0xff]   ;;  %1107 = vmatprep.subr.bf16.mxu1 %v1181_v2  ;;  %1087 = vmatprep.subr.bf16.mxu0 %v1183_v4  ;;  %v1186_v7 = vld [vmem:[%s1472_s1 + $0xb0] sm:$0xff]   ;;  %v1190_v11 = vld [vmem:[%s1472_s1 + $0xa8] sm:$0xff]   ;;  %s1388_s16 = scalar_lea.vmem %s1471_s0, %s1165_s29 }
   0xf   : > { %1108 = vmatpush3.bf16.msra.mxu1 %v1182_v3  ;;  %v1191_v12 = vld [vmem:[%s1472_s1 + $0x60] sm:$0xff]   ;;  %v1195_v16 = vld [vmem:[%s1472_s1 + $0x58] sm:$0xff]   ;;  %v1199_v20 = vld [vmem:[%s1472_s1 + $0x50] sm:$0xff]  }
  0x10   : > { %1109 = vmatprep.subr.bf16.mxu1 %v1185_v6  ;;  %v1192_v13 = vld [vmem:[%s1472_s1 + $0x20] sm:$0xff]   ;;  %v1196_v17 = vld [vmem:[%s1472_s1 + $0x18] sm:$0xff]   ;;  %v1200_v21 = vld [vmem:[%s1472_s1 + $0x10] sm:$0xff]  }
  0x11   : > { %1088 = vmatpush3.bf16.msra.mxu0 %v1184_v5  ;;  %v1193_v14 = vld [vmem:[%s1472_s1 + $0xe0] sm:$0xff]   ;;  %v1197_v18 = vld [vmem:[%s1472_s1 + $0xd8] sm:$0xff]   ;;  %v1201_v22 = vld [vmem:[%s1472_s1 + $0xd0] sm:$0xff]  }
  0x12   : > { %1089 = vmatprep.subr.bf16.mxu0 %v1187_v8  ;;  %v1194_v15 = vld [vmem:[%s1472_s1 + $0xa0] sm:$0xff]   ;;  %v1198_v19 = vld [vmem:[%s1472_s1 + $0x98] sm:$0xff]   ;;  %v1202_v23 = vld [vmem:[%s1472_s1 + $0x90] sm:$0xff]  }
  0x13   : > { %1110 = vmatpush3.bf16.msra.mxu1 %v1186_v7  ;;  %v1203_v24 = vld [vmem:[%s1472_s1 + $0x48] sm:$0xff]   ;;  %v1207_v28 = vld [vmem:[%s1472_s1 + $0x40] sm:$0xff]   ;;  %v1213_v35 = vld [vmem:[%s1472_s1 + $0x178] sm:$0xff]  }
  0x14   : > { %1111 = vmatprep.subr.bf16.mxu1 %v1189_v10  ;;  %v1204_v25 = vld [vmem:[%s1472_s1 + $0x8] sm:$0xff]   ;;  %v1208_v29 = vld [vmem:[%s1472_s1] sm:$0xff]   ;;  %v1216_v39 = vld [vmem:[%s1472_s1 + $0x138] sm:$0xff]  }
  0x15   : > { %1090 = vmatpush3.bf16.msra.mxu0 %v1188_v9  ;;  %v1205_v26 = vld [vmem:[%s1472_s1 + $0xc8] sm:$0xff]   ;;  %v1209_v30 = vld [vmem:[%s1472_s1 + $0xc0] sm:$0xff]   ;;  %v1217_v40 = vld [vmem:[%s1472_s1 + $0x170] sm:$0xff]  }
  0x16   : > { %1091 = vmatprep.subr.bf16.mxu0 %v1191_v12  ;;  %v1206_v27 = vld [vmem:[%s1472_s1 + $0x88] sm:$0xff]   ;;  %v249_v31 = vld [vmem:[%s1388_s16] sm:$0xff]  ;;  %v1218_v41 = vld [vmem:[%s1472_s1 + $0x130] sm:$0xff]  }
  0x17   : > { %1112 = vmatpush3.bf16.msra.mxu1 %v1190_v11  ;;  %v1025_v32 = vcombine.low %v249_v31, %v249_v31  ;;  %v1026_v33 = vcombine.high %v249_v31, %v249_v31  ;;  %v1212_v34 = vld [vmem:[%s1472_s1 + $0x80] sm:$0xff]   ;;  %v250_v36 = vld [vmem:[%s1388_s16 + $0x8] sm:$0xff]  ;;  %v1223_v46 = vld [vmem:[%s1472_s1 + $0x158] sm:$0xff]  }
  0x18   : > { %1113 = vmatprep.subr.bf16.mxu1 %v1193_v14  ;;  %v1027_v37 = vcombine.low %v250_v36, %v250_v36  ;;  %v1028_v38 = vcombine.high %v250_v36, %v250_v36  ;;  %v1219_v42 = vld [vmem:[%s1472_s1 + $0x168] sm:$0xff]   ;;  %v1221_v44 = vld [vmem:[%s1472_s1 + $0x160] sm:$0xff]   ;;  %v1224_v47 = vld [vmem:[%s1472_s1 + $0x118] sm:$0xff]  }
  0x19   : > { %1092 = vmatpush3.bf16.msra.mxu0 %v1192_v13  ;;  %696 = vmatprep.mubr.bf16.mxu0 %v1026_v33  ;;  %v1220_v43 = vld [vmem:[%s1472_s1 + $0x128] sm:$0xff]   ;;  %v1222_v45 = vld [vmem:[%s1472_s1 + $0x120] sm:$0xff]   ;;  %v251_v48 = vld [vmem:[%s1388_s16 + $0x10] sm:$0xff] }
  0x1a   : > { %1093 = vmatprep.subr.bf16.mxu0 %v1195_v16  ;;  %736 = vmatprep.mubr.bf16.mxu1 %v1028_v38  ;;  %v1225_v49 = vld [vmem:[%s1472_s1 + $0x150] sm:$0xff]   ;;  %v1030_v50 = vcombine.high %v251_v48, %v251_v48  ;;  %v1227_v52 = vld [vmem:[%s1472_s1 + $0x148] sm:$0xff]   ;;  %v1229_v54 = vld [vmem:[%s1472_s1 + $0x140] sm:$0xff]   ;;  %v1029_v56 = vcombine.low %v251_v48, %v251_v48 }
  0x1b   : > { %1114 = vmatpush3.bf16.msra.mxu1 %v1194_v15  ;;  %v1226_v51 = vld [vmem:[%s1472_s1 + $0x110] sm:$0xff]   ;;  %v1228_v53 = vld [vmem:[%s1472_s1 + $0x108] sm:$0xff]   ;;  %v1230_v55 = vld [vmem:[%s1472_s1 + $0x100] sm:$0xff]  }
  0x1c   : > { %1115 = vmatprep.subr.bf16.mxu1 %v1197_v18  ;;  %v1024_v3 = vld [vmem:[%s1473_s2] ss:$0 sm:$0xff] }
  0x1d   : > { %1094 = vmatpush3.bf16.msra.mxu0 %v1196_v17  ;;  %v1079_v11 = vld [vmem:[%s1474_s3] ss:$0 sm:$0xff] }
  0x1e   : > { %1095 = vmatprep.subr.bf16.mxu0 %v1199_v20 }
  0x1f   : > { %1116 = vmatpush3.bf16.msra.mxu1 %v1198_v19 }
  0x20   : > { %1117 = vmatprep.subr.bf16.mxu1 %v1201_v22 }
  0x21   : > { %1096 = vmatpush3.bf16.msra.mxu0 %v1200_v21 }
  0x22   : > { %1097 = vmatprep.subr.bf16.mxu0 %v1203_v24 }
  0x23   : > { %1118 = vmatpush3.bf16.msra.mxu1 %v1202_v23 }
  0x24   : > { %1119 = vmatprep.subr.bf16.mxu1 %v1205_v26  ;;  %v1247_v26 = vmov 0  }
  0x25   : > { %1098 = vmatpush3.bf16.msra.mxu0 %v1204_v25  ;;  %1177 = vset.pattern.permute.xlu1 %v1247_v26 }
  0x26   : > { %1099 = vmatprep.subr.bf16.mxu0 %v1207_v28  ;;  %1178 = vset.pattern.permute.xlu0 %v1247_v26 }
  0x27   : > { %1120 = vmatpush3.bf16.msra.mxu1 %v1206_v27 }
  0x28   : > { %1121 = vmatprep.subr.bf16.mxu1 %v1209_v30 }
  0x29   : > { %1100 = vmatpush3.bf16.msra.mxu0 %v1208_v29 }
  0x2a   : > { %1129 = vmatprep.subr.bf16.mxu0 %v1213_v35 }
  0x2b   : > { %1122 = vmatpush3.bf16.msra.mxu1 %v1212_v34 }
  0x2c   : > { %697 = vmatmul.mubr.bf16.vlgmr.msra.gmra.mxu0 %v1025_v32  ;;  %1155 = vmatprep.subr.mxu1 %v1245_v57  ;;  %v955_v32 = vld [vmem:[%s1475_s4] sm:$0xff] }
  0x2d   : > { %1130 = vmatpush3.bf16.msra.mxu0 %v1216_v39  ;;  %776 = vmatprep.mubr.bf16.mxu0 %v1030_v50 }
  0x2e   : > { %737 = vmatmul.mubr.bf16.vlgmr.msra.gmra.mxu1 %v1027_v37  ;;  %1131 = vmatprep.subr.bf16.mxu0 %v1217_v40  ;;  %v968_v40 = vld [vmem:[%s1476_s5] sm:$0x1] }
  0x2f   : > { %1157 = vmatprep.mubr.msk.f32.mxu1 %vm1246_vm0, %v1245_v57 }
  0x31   : > { %1132 = vmatpush3.bf16.msra.mxu0 %v1218_v41 }
  0x32   : > { %1133 = vmatprep.subr.bf16.mxu0 %v1219_v42 }
  0x35   : > { %1134 = vmatpush3.bf16.msra.mxu0 %v1220_v43 }
  0x36   : > { %1135 = vmatprep.subr.bf16.mxu0 %v1221_v44 }
  0x39   : > { %1136 = vmatpush3.bf16.msra.mxu0 %v1222_v45 }
  0x3a   : > { %1137 = vmatprep.subr.bf16.mxu0 %v1223_v46 }
  0x3d   : > { %1138 = vmatpush3.bf16.msra.mxu0 %v1224_v47 }
  0x3e   : > { %1139 = vmatprep.subr.bf16.mxu0 %v1225_v49 }
  0x41   : > { %1140 = vmatpush3.bf16.msra.mxu0 %v1226_v51 }
  0x42   : > { %1141 = vmatprep.subr.bf16.mxu0 %v1227_v52 }
  0x45   : > { %1142 = vmatpush3.bf16.msra.mxu0 %v1228_v53 }
  0x46   : > { %1143 = vmatprep.subr.bf16.mxu0 %v1229_v54 }
  0x49   : > { %1144 = vmatpush3.bf16.msra.mxu0 %v1230_v55 }
  0x4c   : > { %777 = vmatmul.mubr.bf16.vlgmr.msra.gmra.mxu0 %v1029_v56 }
  0xec   : > { %v1101_v58 = vpop.f32.mrf.mxu0 }
  0xee   : > { %v1102_v59 = vpop.f32.mrf.mxu0  ;;  %v1123_v60 = vpop.f32.mrf.mxu1 }
  0xef   : > { %v1103_v2 = vadd.f32 %v1102_v59, %v1101_v58 }
  0xf0   : > { %v1104_v61 = vpop.f32.mrf.mxu0  ;;  %v1124_v62 = vpop.f32.mrf.mxu1 }
  0xf1   : > { %v699_v4 = vadd.f32 %v1103_v2, %v1024_v3  ;;  %v1125_v5 = vadd.f32 %v1124_v62, %v1123_v60 }
  0xf2   : > { %v1105_v63 = vpop.f32.mrf.mxu0  ;;  %v1126_v0 = vpop.f32.mrf.mxu1 }
  0xf3   : > { %v739_v8 = vadd.f32 %v1125_v5, %v699_v4 }
  0xf4   : > { %v1127_v1 = vpop.f32.mrf.mxu1 }
 0x10c   : > { %v1145_v6 = vpop.f32.mrf.mxu0 }
 0x10e   : > { %v1146_v7 = vpop.f32.mrf.mxu0 }
 0x10f   : > { %v1147_v9 = vadd.f32 %v1146_v7, %v1145_v6 }
 0x110   : > { %v1148_v10 = vpop.f32.mrf.mxu0 }
 0x111   : > { %v779_v12 = vadd.f32 %v1147_v9, %v739_v8 }
 0x112   : > { %v1149_v13 = vpop.f32.mrf.mxu0 }
 0x113   : > { %1156 = vmatpush3.xpose.msk.msra.mxu1 %vm792_vm1, %v779_v12  ;;  %v791_v14 = vmul.f32 %v1079_v11, %v779_v12 }
 0x114   : > { %1160 = vmatprep.subr.mxu1 %v1245_v57 }
 0x115   : > { %v793_v15 = vsel %vm792_vm1, %v791_v14, 0.0 }
 0x116   : > { %1158 = vmatmul.mubr.msk.f32.vlgmr.msra.gmra.mxu1 %vm792_vm1, %v779_v12 }
 0x117   : > { %1162 = vmatprep.mubr.msk.f32.mxu1 %vm1246_vm0, %v1245_v57 }
 0x1d6   : > { %v865_v16 = vpop.f32.mrf.mxu1 }
 0x1d7   : > { %v869_v17 = vmul.f32 0.25, %v865_v16 }
 0x1d8   : > { %v1159_v18 = vpop.f32.mrf.mxu1 }
 0x1d9   : > { %v871_v19 = vsel %vm870_vm2, %v869_v17, -inf }
 0x1da   : > { %872 = vmax.xlane.f32.xlu0 %v871_v19 }
 0x1de   : > { %794 = vadd.xlane.f32.xlu0 %v793_v15 }
 0x263   : > { %v873_v20 = vpop.xlane.xlu0 %872 }
 0x264   : > { %v874_v21 = vsub.f32 %v869_v17, %v873_v20 }
 0x266   : > { %v875_v22 = vmul.f32 1.442695, %v874_v21 }
 0x267   : > { %v795_v23 = vpop.xlane.xlu0 %794 }
 0x268   : > { %1233 = vpow2.f32 %v875_v22  ;;  %1161 = vmatpush3.msra.mxu1 %v795_v23 }
 0x275   : > { %v1234_v24 = vpop.eup %1233 }
 0x276   : > { %1163 = vmatmul.mubr.msk.f32.vlgmr.msra.gmra.mxu1 %vm870_vm2, %v1234_v24  ;;  %v877_v25 = vsel %vm870_vm2, %v1234_v24, 0.0 }
 0x277   : > { %878 = vadd.xlane.f32.xlu1 %v877_v25 }
 0x300   : > { %v879_v27 = vpop.xlane.xlu1 %878 }
 0x301   : > { %1235 = vrcp.f32 %v879_v27 }
 0x30e   : > { %v1236_v28 = vpop.eup %1235 }
 0x336   : > { %v949_v29 = vpop.f32.mrf.mxu1 }
 0x337   : > { %v954_v30 = vmul.f32 %v1236_v28, %v949_v29 }
 0x338   : > { %v1164_v31 = vpop.f32.mrf.mxu1 }
 0x339   : > { %958 = vperm.xlu1 %1177, %v954_v30  }
 0x3b4   : > { %v959_v33 = vpop.permute.xlu1 %958 }
 0x3b5   : > { %v961_v34 = vmul.f32 %v959_v33, %v955_v32 }
 0x3b7   : > { %v962_v35 = vrot.slane %v961_v34, 4 }
 0x3b9   : > { %v963_v36 = vadd.f32 %v962_v35, %v961_v34 }
 0x3bb   : > { %v964_v37 = vrot.slane %v963_v36, 2 }
 0x3bd   : > { %v965_v38 = vadd.f32 %v964_v37, %v963_v36 }
 0x3bf   : > { %v966_v39 = vrot.slane %v965_v38, 1 }
 0x3c1   : > { %v967_v41 = vadd.f32 %v966_v39, %v965_v38 }
 0x3c3   : > { %v969_v42 = vadd.f32 %v968_v40, %v967_v41 }
 0x3c5   : > { %970 = vst [vmem:[%s247_s24] sm:$0x1] %v969_v42 }
 0x3c6 PF: > { %s16_s21 = sadd.s32 1, %s1243_s21  }
 0x3c7   : > { %p13_p4 = scmp.ge.s32.totalorder %s16_s21, 4  }
 0x3c9   :  { %15 = sbr.rel (!%p13_p4) target bundleno = 1 (0x1), region = 74 }

</bundles_post_ra>
